<compile_context>
chip_gen: v7x
topology: tpu7x:2x2x1
jax: 0.10.0
libtpu: 0.0.40
codegen_flags: <defaults>
</compile_context>

<pallas_src>
import jax
import jax.numpy as jnp
from jax import lax
from jax.experimental import pallas as pl
from jax.experimental.pallas import tpu as pltpu


def _conv1d_kernel(x_ref, w_ref, b_ref, o_ref):
    # x_ref: (1, K*Cin, TL)  f32 im2col input tile (channels on sublanes, L on lanes)
    # w_ref: (Cout, K*Cin)   f32 folded weights
    # b_ref: (Cout, 1)       f32 bias
    # o_ref: (1, Cout, TL)   f32 output tile (lane-dense along L)
    acc = jnp.dot(w_ref[...], x_ref[0], preferred_element_type=jnp.float32)
    o_ref[0] = acc + b_ref[...]          # bias broadcast over the lane (L) axis


def _choose_l_tile(L, kc, cout, vmem_budget_bytes):
    """Largest L tile (multiple of 128) whose double-buffered f32 in+out tiles fit."""
    if L <= 512:
        return L                         # single full-extent tile along L
    tl = 512
    while tl > 128 and 2 * 4 * tl * (kc + cout) > vmem_budget_bytes:
        tl //= 2
    return tl


def conv1d_with_init_forward(x, weight, bias, *, l_tile=None,
                             vmem_limit_bytes=40 * 1024 * 1024):
    """Same-padded 1D conv, identity activation (matches Conv1d_with_init.forward).

    x:      (B, Cin, L)   any float dtype (cast to f32, matching x.to(torch.float32))
    weight: (Cout, Cin, K)
    bias:   (Cout,)
    returns (B, Cout, L) float32
    """
    B, Cin, L = x.shape
    Cout, Cin_w, K = weight.shape
    assert Cin_w == Cin
    pad_left = (K - 1) // 2              # nn.Conv1d(padding=(K-1)//2)
    pad_right = K - 1 - pad_left

    x = x.astype(jnp.float32)
    kc = K * Cin

    tl = l_tile if l_tile is not None else _choose_l_tile(
        L, kc, Cout, vmem_budget_bytes=vmem_limit_bytes // 2)
    n_t = -(-L // tl)                    # ceil
    Lp = n_t * tl                        # padded L so blocks tile evenly

    # im2col along channels (single fused pad+slice+concat pass over x in HBM):
    #   x_col[b, k*Cin + c, l] = x_padded[b, c, l + k]
    x_pad = jnp.pad(x, ((0, 0), (0, 0), (pad_left, (Lp - L) + pad_right)))
    x_col = jnp.concatenate([x_pad[:, :, k:k + Lp] for k in range(K)], axis=1)

    # w_col[co, k*Cin + ci] = weight[co, ci, k]
    w_col = jnp.transpose(weight.astype(jnp.float32), (0, 2, 1)).reshape(Cout, kc)
    b_col = bias.astype(jnp.float32).reshape(Cout, 1)

    out = pl.pallas_call(
        _conv1d_kernel,
        out_shape=jax.ShapeDtypeStruct((B, Cout, Lp), jnp.float32),
        grid=(B, n_t),
        in_specs=[
            pl.BlockSpec((1, kc, tl), lambda b, t: (b, 0, t)),   # input tile
            pl.BlockSpec((Cout, kc), lambda b, t: (0, 0)),       # weights (resident)
            pl.BlockSpec((Cout, 1), lambda b, t: (0, 0)),        # bias (resident)
        ],
        out_specs=pl.BlockSpec((1, Cout, tl), lambda b, t: (b, 0, t)),
        compiler_params=pltpu.CompilerParams(
            dimension_semantics=("parallel", "parallel"),
            vmem_limit_bytes=vmem_limit_bytes,
        ),
    )(x_col, w_col, b_col)

    return out if Lp == L else out[:, :, :L]


def init_params(key, in_channels, out_channels, kernel_size=3):
    """Deterministic parameter init mirroring Conv1d_with_init.__init__."""
    kw, kb = jax.random.split(key)
    fan_in = in_channels * kernel_size
    # nn.init.kaiming_normal_ (fan_in, a=0): std = sqrt(2 / fan_in)
    w_std = jnp.sqrt(2.0 / fan_in)
    weight = w_std * jax.random.normal(
        kw, (out_channels, in_channels, kernel_size), dtype=jnp.float32)
    # default nn.Conv1d bias init: U(-1/sqrt(fan_in), 1/sqrt(fan_in))
    bound = 1.0 / jnp.sqrt(fan_in)
    bias = jax.random.uniform(
        kb, (out_channels,), dtype=jnp.float32, minval=-bound, maxval=bound)
    return weight, bias


def _reference_conv1d(x, weight, bias):
    # Pure-JAX reference (NCL conv with SAME-style padding) for a sanity check.
    K = weight.shape[-1]
    pad = (K - 1) // 2
    y = lax.conv_general_dilated(
        x.astype(jnp.float32),
        weight.astype(jnp.float32),
        window_strides=(1,),
        padding=((pad, K - 1 - pad),),
        dimension_numbers=("NCH", "OIH", "NCH"),
    )
    return y + bias.reshape(1, -1, 1)


if __name__ == "__main__":
    key = jax.random.PRNGKey(0)
    k_x, k_p, k_x2 = jax.random.split(key, 3)

    # Small shapes consistent with the module (x is (B, Cin, L)).
    B, Cin, Cout, L, K = 2, 4, 8, 16, 3
    x = jax.random.normal(k_x, (B, Cin, L), dtype=jnp.float32)
    weight, bias = init_params(k_p, Cin, Cout, K)

    out = jax.block_until_ready(conv1d_with_init_forward(x, weight, bias))
    ref = _reference_conv1d(x, weight, bias)
    assert out.shape == (B, Cout, L)
    assert jnp.allclose(out, ref, atol=1e-4, rtol=1e-4)

    # Longer sequence to exercise the tiled / pipelined path (grid over L tiles).
    L2 = 1280
    x2 = jax.random.normal(k_x2, (B, Cin, L2), dtype=jnp.float32)
    out2 = jax.block_until_ready(conv1d_with_init_forward(x2, weight, bias))
    ref2 = _reference_conv1d(x2, weight, bias)
    assert out2.shape == (B, Cout, L2)
    assert jnp.allclose(out2, ref2, atol=1e-4, rtol=1e-4)

    print("KERNEL_OK")
</pallas_src>

<mosaic_0001>
module attributes {stable_mosaic.version = 11 : i64} {
  func.func @_conv1d_kernel(%arg0: i32, %arg1: i32, %arg2: memref<1x12x16xf32, #tpu.memory_space<vmem>>, %arg3: memref<8x12xf32, #tpu.memory_space<vmem>>, %arg4: memref<8x1xf32, #tpu.memory_space<vmem>>, %arg5: memref<1x8x16xf32, #tpu.memory_space<vmem>>) attributes {dimension_semantics = [#tpu.dimension_semantics<parallel>, #tpu.dimension_semantics<parallel>], iteration_bounds = array<i64: 2, 1>, scalar_prefetch = 0 : i64, scratch_operands = 0 : i64, tpu.core_type = #tpu.core_type<tc>, window_params = [{transform_indices = @transform_0, window_bounds = array<i64: 1, 12, 16>}, {pipeline_mode = #tpu.pipeline_mode<synchronous>, transform_indices = @transform_1, window_bounds = array<i64: 8, 12>}, {pipeline_mode = #tpu.pipeline_mode<synchronous>, transform_indices = @transform_2, window_bounds = array<i64: 8, 1>}, {transform_indices = @transform_3, window_bounds = array<i64: 1, 8, 16>}]} {
    %c0 = arith.constant 0 : index
    %c0_0 = arith.constant 0 : index
    %0 = vector.load %arg3[%c0, %c0_0] : memref<8x12xf32, #tpu.memory_space<vmem>>, vector<8x12xf32>
    %c0_1 = arith.constant 0 : index
    %c0_2 = arith.constant 0 : index
    %c0_3 = arith.constant 0 : index
    %1 = vector.load %arg2[%c0_1, %c0_2, %c0_3] : memref<1x12x16xf32, #tpu.memory_space<vmem>>, vector<1x12x16xf32>
    %2 = vector.shape_cast %1 : vector<1x12x16xf32> to vector<12x16xf32>
    %cst = arith.constant dense<0.000000e+00> : vector<8x16xf32>
    %3 = tpu.matmul %0, %2, %cst {dimension_numbers = #tpu.dot_dimension_numbers<[1], [0], [0], [1], [0, 0, 1, 1], [], []>} : vector<8x12xf32>, vector<12x16xf32>, vector<8x16xf32> -> vector<8x16xf32>
    %c0_4 = arith.constant 0 : index
    %c0_5 = arith.constant 0 : index
    %4 = vector.load %arg4[%c0_4, %c0_5] : memref<8x1xf32, #tpu.memory_space<vmem>>, vector<8x1xf32>
    %5 = vector.broadcast %4 : vector<8x1xf32> to vector<8x16xf32>
    %6 = arith.addf %3, %5 : vector<8x16xf32>
    %c0_6 = arith.constant 0 : index
    %c0_7 = arith.constant 0 : index
    %c0_8 = arith.constant 0 : index
    %7 = vector.load %arg5[%c0_6, %c0_7, %c0_8] : memref<1x8x16xf32, #tpu.memory_space<vmem>>, vector<1x8x16xf32>
    %8 = vector.shape_cast %7 : vector<1x8x16xf32> to vector<8x16xf32>
    %9 = vector.shape_cast %6 : vector<8x16xf32> to vector<1x8x16xf32>
    tpu.vector_store %arg5[%c0_6, %c0_7, %c0_8], %9 {strides = array<i32>} : memref<1x8x16xf32, #tpu.memory_space<vmem>>, vector<1x8x16xf32>,
    return
  }
  func.func @transform_0(%arg0: i32, %arg1: i32) -> (i32, i32, i32) {
    %c0_i32 = arith.constant 0 : i32
    %c0_i32_0 = arith.constant 0 : i32
    return %arg0, %c0_i32, %arg1 : i32, i32, i32
  }
  func.func @transform_1(%arg0: i32, %arg1: i32) -> (i32, i32) {
    %c0_i32 = arith.constant 0 : i32
    %c0_i32_0 = arith.constant 0 : i32
    %c0_i32_1 = arith.constant 0 : i32
    return %c0_i32, %c0_i32_0 : i32, i32
  }
  func.func @transform_2(%arg0: i32, %arg1: i32) -> (i32, i32) {
    %c0_i32 = arith.constant 0 : i32
    %c0_i32_0 = arith.constant 0 : i32
    %c0_i32_1 = arith.constant 0 : i32
    return %c0_i32, %c0_i32_0 : i32, i32
  }
  func.func @transform_3(%arg0: i32, %arg1: i32) -> (i32, i32, i32) {
    %c0_i32 = arith.constant 0 : i32
    %c0_i32_0 = arith.constant 0 : i32
    return %arg0, %c0_i32, %arg1 : i32, i32, i32
  }
}

</mosaic_0001>

<bundles_post_ra>
// kernel: tpu_custom_call.1
= control target key start
LH: loop header
LB: loop body
LE: loop exit
PB: predicated region body
PF: predicated region fallthrough
CT: control target
= control target key end

     0   :  { %8 = vsyncpa [#allocation3], 0  ;;  %s686_s0 = inlined_call_operand.vmem [shape: f32[2,12,16], index: 0, kind: input, shape index: {}]   ;;  %s687_s1 = inlined_call_operand.vmem [shape: f32[8,12], index: 1, kind: input, shape index: {}]   ;;  %s688_s2 = inlined_call_operand.vmem [shape: f32[8,1], index: 2, kind: input, shape index: {}]   ;;  %s689_s3 = inlined_call_operand.hbm [shape: f32[2,8,16], index: 3, kind: output, shape index: {}]  }
   0x1   :  { %10 = vsyncpa [#allocation3 + $0x1], 0  ;;  %s568_s12 = smov 0   ;;  %s570_s13 = smov 0  }
   0x2   :  { %s572_s14 = smov 0   ;;  %s574_s15 = smov 0  }
   0x3   :  { %s576_s16 = smov 0   ;;  %s578_s17 = smov 0  }
   0x4 LB: > { %s372_s18 = sadd.s32 4294967295, %s540_s17   ;;  %s373_s19 = sadd.s32 4294967294, %s540_s17   ;;  %s540_s17 = sphi %s578_s17, %s16_s17   ;;  %s536_s16 = sphi %s576_s16, %s696_s16   ;;  %s532_s15 = sphi %s574_s15, %s695_s15   ;;  %s528_s14 = sphi %s572_s14, %s694_s14   ;;  %s524_s13 = sphi %s570_s13, %s693_s13   ;;  %s520_s12 = sphi %s568_s12, %s692_s12  }
   0x5   : > { %s28_s20 = sadd.s32 1, %s536_s16  ;;  %s107_s21 = sadd.s32 1, %s528_s14 }
   0x6   : > { %p30_p0 = scmp.ge.s32.totalorder %s28_s20, 2  ;;  %p117_p1 = scmp.ne.s32.totalorder %s528_s14, %s524_s13 }
   0x7   : > { %p118_p2 = scmp.eq.s32.totalorder %s372_s18, 1  ;;  %p123_p3 = scmp.ne.s32.totalorder %s524_s13, %s520_s12 }
   0x8   : > { %s698_s20 = smov (%p30_p0, %s28_s20), 0  ;;  %p124_p5 = scmp.eq.s32.totalorder %s373_s19, 1 }
   0x9   : > { %p608_p4 = por %p118_p2, %p117_p1  ;;  %s102_s23 = ssub.s32 %s536_s16, %s698_s20 }
   0xa   : > { %p376_p6 = scmp.ge.s32.totalorder %s540_s17, 1  ;;  %p105_p7 = scmp.eq.s32.totalorder %s102_s23, 0 }
   0xb   : > { %p615_p8 = por %p124_p5, %p123_p3  ;;  %p159_p9 = scmp.lt.s32.totalorder %s540_s17, 3 }
   0xc   : > { %s621_s25 = scalar_select %p105_p7, %s528_s14, %s107_s21  }
   0xd   : > { %p160_p10 = pnand %p376_p6, %p159_p9 }
   0xe   : > { %p186_p11 = scmp.lt.s32.totalorder (!%p160_p10), %s532_s15, 1  ;;  %v542_v0 = vmov (!%p160_p10), 0.0|0.0   ;;  %v197_v1 = vld [vmem:[%s688_s2] sm:$0xff] (!%p160_p10)  ;;  %vm543_vm0 = vmmov (!%p160_p10), 0   ;;  %v544_v2 = vmov (!%p160_p10), 0.0   ;;  %v545_v3 = vmov (!%p160_p10), 0  }
   0xf   : > { %163 = sbr.rel (%p160_p10) target bundleno = 260 (0x104), region = 32  ;;  %397 = vmatprep.subr.bf16.mxu0 (!%p160_p10), %v542_v0  ;;  %394 = vmatprep.mubr.msk.f32.mxu0 (!%p160_p10), %vm543_vm0, %v544_v2  ;;  %vm207_vm1 = vcmask (!%p160_p10), 1043456   ;;  %vm546_vm2 = vmmov (!%p160_p10), 1   ;;  %v194_v7 = vld [vmem:[%s687_s1] sm:$0xff] (!%p160_p10)  ;;  %vm203_vm4 = vcmask (!%p160_p10), 97280   ;;  %s183_s8 = sand.u32 (!%p160_p10), 1, %s524_s13  }
  0x10   : > { %461 = vset.pattern.permute.xlu0 (!%p160_p10), %v545_v3  ;;  %vm399_vm3 = vmpackc.low (!%p160_p10), %vm207_vm1, %vm546_vm2  ;;  %s377_s9 = sshll.u32 (!%p160_p10), %s183_s8, 3  ;;  %s383_s10 = sshll.u32 (!%p160_p10), %s532_s15, 7  ;;  %vm281_vm5 = vcmask (!%p160_p10), 130048  }
  0x11   : > { %200 = vperm.xlu0 (!%p160_p10), %461, %v197_v1   ;;  %s185_s11 = scalar_lea.vmem (!%p160_p10), [#allocation2], %s377_s9  ;;  %s639_s23 = scalar_lea.hbm (!%p160_p10), %s689_s3, %s383_s10 }
  0x12   : > { %s298_s18 = sshll.u32 (!%p160_p10), %s185_s11, 4  ;;  %s284_s26 = scalar_lea.sflag (!%p160_p10), [#allocation3], %s183_s8  ;;  %s641_s18 = int_to_ptr.vmem [resolvable:$true] %s298_s18 }
  0x13   : > { %s462_s27 = scalar_lea.vmem (!%p160_p10), %s641_s18, 128 }
  0x14   : > { %p463_p12 = scmp.ne.s32.totalorder (!%p160_p10), %s641_s18, %s462_s27 }
  0x16   : > { %s187_s28 = scalar_select %p186_p11, %s532_s15, 1 }
  0x17   : > { %p464_p13 = pnand %p463_p12, %p608_p4  ;;  %s547_s15 = smov [#allocation2]  }
  0x18   : > { %s386_s29 = sshll.u32 %s187_s28, 4  ;;  %s466_s28 = sshll.u32 %s547_s15, 4  ;;  %s467_s28 = int_to_ptr.vmem [resolvable:$false] %s466_s28 }
  0x19   : > { %s193_s5 = scalar_lea.vmem %s686_s0, %s386_s29  ;;  %p465_p0 = pneg %p464_p13 }
  0x1a   : > { %v195_v4 = vld [vmem:[%s193_s5] sm:$0xff]  ;;  %v196_v5 = vld [vmem:[%s193_s5 + $0x8] sm:$0xf]  ;;  %s468_s29 = scalar_lea.vmem %s467_s28, 256  ;;  %p469_p1 = scmp.lt.s32.totalorder %s641_s18, %s467_s28 }
  0x1b   : > { %v398_v6 = vpack.c.bf16 %v196_v5, %v195_v4  ;;  %p470_p2 = scmp.lt.s32.totalorder %s468_s29, %s462_s27 }
  0x1d   : > { %400 = vmatpush3.bf16.msk.msra.mxu0 %vm399_vm3, %v398_v6  ;;  %p471_p3 = por %p470_p2, %p469_p1 }
  0x1f   : > { %p472_p5 = pnand %p471_p3, %p465_p0 }
  0x20   : > { %395 = vmatmul.mubr.msk.f32.vlgmr.msra.gmra.mrb[0].mxu0 %vm203_vm4, %v194_v7 }
  0x90   : > { %v201_v8 = vpop.permute.xlu0 %200 }
  0xf3   : > { %v277_v9 = vpop.f32.mrb[0].mxu0 }
  0xf4   : > { %v278_v10 = vadd.f32 %v277_v9, %v201_v8  ;;  %v396_v11 = vpop.f32.mrb[1].mxu0 }
  0xf6   : > { %282 = vst.msk [vmem:[%s185_s11] sm:$0xff] %vm281_vm5, %v278_v10 }
  0xf7   : > { %475 = shalt.err (!%p472_p5)
}
  0xf8   : > { %s476_s30 = scalar_lea.hbm %s639_s23, 128  ;;  %s480_s6 = scalar_lea.hbm %s689_s3, 256 }
  0xf9   : > { %p477_p6 = scmp.ne.s32.totalorder %s639_s23, %s476_s30  ;;  %p481_p10 = scmp.lt.u32.totalorder %s639_s23, %s689_s3 }
  0xfa   : > { %p482_p11 = scmp.lt.u32.totalorder %s480_s6, %s476_s30  ;;  %p484_p13 = scmp.lt.u32.totalorder %s476_s30, %s639_s23 }
  0xfb   : > { %p478_p7 = pnand %p477_p6, %p608_p4 }
  0xfc   : > { %p483_p12 = por %p482_p11, %p481_p10 }
  0xfd   : > { %p479_p9 = pneg %p478_p7 }
  0xfe   : > { %p485_p0 = por %p484_p13, %p483_p12 }
 0x100   : > { %p486_p1 = pnand %p485_p0, %p479_p9 }
 0x102   : > { %489 = shalt.err (!%p486_p1)
}
 0x103   : > { %401 = dma.vmem_to_hbm [thread:$0]  (%p608_p4), %s641_s18, 128, %s639_s23, %s284_s26  }
 0x104 PF: > { %p407_p2 = scmp.ge.s32.totalorder %s540_s17, 2  ;;  %s310_s9 = sand.u32 1, %s520_s12  }
 0x105   : > { %s311_s10 = scalar_lea.sflag [#allocation3], %s310_s9 }
 0x106   : > { %p404_p3 = pnand %p407_p2, %p615_p8 }
 0x108   : > { %515 = dma.done.wait (!%p404_p3), %s311_s10, 128  }
 0x109   : > { %517 = vsyncadd (!%p404_p3), %s311_s10, 4294967168  ;;  %s16_s17 = sadd.s32 1, %s540_s17   ;;  %s692_s12 = smov %s524_s13 }
 0x10a   : > { %p13_p5 = scmp.ge.s32.totalorder %s16_s17, 4   ;;  %s693_s13 = smov %s528_s14 }
 0x10b   : > { %s694_s14 = smov %s621_s25  ;;  %s695_s15 = smov %s536_s16 }
 0x10c   : > { %s696_s16 = smov %s698_s20  ;;  %15 = sbr.rel (!%p13_p5) target bundleno = 4 (0x4), region = 67 }
 0x113   :  { %316 = vsyncpa [#allocation3], 1 }
 0x114   :  { %318 = vsyncpa [#allocation3 + $0x1], 1 }

</bundles_post_ra>
